<compile_context>
chip_gen: v7x
topology: tpu7x:2x2x1
jax: 0.10.0
libtpu: 0.0.40
codegen_flags: <defaults>
</compile_context>

<pallas_src>
import functools

import jax
import jax.numpy as jnp
from jax.experimental import pallas as pl
from jax.experimental.pallas import tpu as pltpu

_MiB = 1024 * 1024


def _round_up(x, m):
    return (x + m - 1) // m * m


# ---------------------------------------------------------------------------
# Kernels
# ---------------------------------------------------------------------------
def _ffn_kernel_f32out(x_ref, w1_ref, b1_ref, w2_ref, b2_ref, o_ref):
    """f32 output: accumulate directly into the resident output block.

    The out block's index_map is constant over the hidden axis, so it stays in
    VMEM across all f steps; accumulating into it saves the (tm, E) f32 scratch
    and the final full-tile copy/cast.
    """
    f = pl.program_id(1)
    # (tm, E) @ (E, tf) -> (tm, tf) on the MXU with f32 accumulation.
    h = jnp.dot(x_ref[...], w1_ref[...], preferred_element_type=jnp.float32)
    h = jnp.maximum(h + b1_ref[...], 0.0)           # bias + ReLU
    # dropout == identity (eval mode)
    part = jnp.dot(h.astype(w2_ref.dtype), w2_ref[...],
                   preferred_element_type=jnp.float32)

    @pl.when(f == 0)
    def _():
        o_ref[...] = part + b2_ref[...]

    @pl.when(f != 0)
    def _():
        o_ref[...] += part


def _ffn_kernel_acc(x_ref, w1_ref, b1_ref, w2_ref, b2_ref, o_ref, acc_ref):
    """Narrow output dtype (e.g. bf16): accumulate in an f32 VMEM scratch."""
    f = pl.program_id(1)

    @pl.when(f == 0)
    def _():
        acc_ref[...] = jnp.zeros_like(acc_ref)

    h = jnp.dot(x_ref[...], w1_ref[...], preferred_element_type=jnp.float32)
    h = jnp.maximum(h + b1_ref[...], 0.0)           # bias + ReLU
    # dropout == identity (eval mode)
    acc_ref[...] += jnp.dot(h.astype(w2_ref.dtype), w2_ref[...],
                            preferred_element_type=jnp.float32)

    @pl.when(f == pl.num_programs(1) - 1)
    def _():
        o_ref[...] = (acc_ref[...] + b2_ref[...]).astype(o_ref.dtype)


# ---------------------------------------------------------------------------
# Generation-aware VMEM budget + tile derivation
# ---------------------------------------------------------------------------
@functools.lru_cache(maxsize=1)
def _vmem_limits():
    """Returns (vmem_limit_bytes for CompilerParams, usable bytes for tiling)."""
    cap = None
    try:
        info = pltpu.get_tpu_info()
        for attr in ("vmem_capacity_bytes", "vmem_size_bytes", "vmem_bytes"):
            v = getattr(info, attr, None)
            if v:
                cap = int(v)
                break
    except Exception:
        cap = None
    if not cap:
        cap = 64 * _MiB                        # conservative: smallest (v7x) VMEM
    # ~48 MiB on 64-MiB parts (v7x), ~96 MiB on 128-MiB parts (v5e/v6e).
    limit = max(32 * _MiB, min(cap - 16 * _MiB, (3 * cap) // 4, 100 * _MiB))
    usable = limit - 4 * _MiB                  # headroom for compiler scratch
    return limit, usable


def _choose_tiles(M, E, F, x_item, w_item, out_item, needs_acc, usable,
                  tm_req, tf_req):
    # Feature axes: lane-dense (128) at minimum, multiples of 256 when large so
    # the 2x256x256 MXUs of v6e/v7x are filled.
    E_pad = _round_up(E, 256 if E > 128 else 128)
    f_align = 256 if F > 128 else 128

    # Double-buffered per-row VMEM cost of x + out tiles (+ acc scratch row).
    per_row = E_pad * (2 * x_item + 2 * out_item + (4 if needs_acc else 0))

    def w_tile_bytes(tf_):  # double-buffered W1 + W2 (+ bias) tiles
        return 4 * E_pad * tf_ * w_item + 8 * (tf_ + E_pad) * 4

    # Hidden-axis tile: large tf => fewer grid steps / accumulator passes, but
    # keep room for >= ~512 rows so tm (the HBM-traffic lever) stays big.
    if tf_req is not None:
        tf = tf_req
    else:
        tf = min(_round_up(F, f_align), 2048)
        while tf > f_align and (usable - w_tile_bytes(tf)) < 512 * per_row:
            tf = max(f_align, tf // 2)

    # Row tile: W1/W2 are re-streamed from HBM once per row tile, so tm sets
    # the arithmetic intensity (~2*tm/itemsize flop per weight byte).  Fill the
    # remaining VMEM budget with rows.
    if tm_req is not None:
        tm = tm_req
    elif M <= 128:
        tm = _round_up(max(M, 8), 8)           # tiny problems: no wasteful pad
    else:
        rows_budget = max(0, usable - w_tile_bytes(tf))
        tm = min(rows_budget // per_row, 2048, _round_up(M, 256))
        tm = max(256, (tm // 256) * 256)
        # Keep >= 2 row tiles so the "parallel" axis can shard across both v7x
        # TensorCores (only worth it while tm stays >= 512: smaller tm would
        # re-stream weights too often on single-TC v5e/v6e).
        if _round_up(M, tm) // tm < 2 and tm > 512:
            tm = max(512, _round_up((M + 1) // 2, 256))
    return tm, tf, E_pad


# ---------------------------------------------------------------------------
# Wrapper
# ---------------------------------------------------------------------------
@functools.partial(jax.jit, static_argnames=("tm", "tf", "compute_dtype"))
def feed_forward(x, w1, b1, w2, b2, *, tm=None, tf=None, compute_dtype=None):
    """FeedForward forward pass (eval mode): relu(x @ W1 + b1) @ W2 + b2.

    x: (B, S, E).  w1: (E, F), b1: (F,), w2: (F, E), b2: (E,)  -- weights are
    stored (in, out), i.e. transposed vs. nn.Linear.  If `compute_dtype` is set
    (e.g. jnp.bfloat16), x/W1/W2 are streamed in that dtype; accumulation is
    always f32 and the output keeps x's original dtype.
    """
    B, S, E = x.shape
    F = w1.shape[1]
    M = B * S

    out_dtype = x.dtype
    stream_dtype = jnp.dtype(compute_dtype) if compute_dtype is not None else None
    x_dtype = stream_dtype if stream_dtype is not None else jnp.dtype(x.dtype)
    w_dtype = stream_dtype if stream_dtype is not None else jnp.dtype(w1.dtype)
    x_item = jnp.dtype(x_dtype).itemsize
    w_item = jnp.dtype(w_dtype).itemsize
    out_item = jnp.dtype(out_dtype).itemsize
    needs_acc = jnp.dtype(out_dtype) != jnp.dtype(jnp.float32)

    vmem_limit, usable = _vmem_limits()
    tm_eff, tf_eff, E_pad = _choose_tiles(M, E, F, x_item, w_item, out_item,
                                          needs_acc, usable, tm, tf)
    M_pad = _round_up(M, tm_eff)
    F_pad = _round_up(F, tf_eff)
    grid = (M_pad // tm_eff, F_pad // tf_eff)

    # Operand prep: casts + pads only when actually needed (a per-call pad is
    # an extra HBM round-trip of x/W1/W2 before the kernel even starts).
    def _prep(a, rows, cols, dtype):
        if a.dtype != dtype:
            a = a.astype(dtype)
        pad_r, pad_c = rows - a.shape[0], cols - a.shape[1]
        if pad_r or pad_c:
            a = jnp.pad(a, ((0, pad_r), (0, pad_c)))
        return a

    x2 = _prep(x.reshape(M, E), M_pad, E_pad, x_dtype)
    w1p = _prep(w1, E_pad, F_pad, w_dtype)
    w2p = _prep(w2, F_pad, E_pad, w_dtype)
    # Biases stay f32: they are added to the f32 accumulator and are tiny.
    b1p = _prep(b1.reshape(1, F), 1, F_pad, jnp.float32)
    b2p = _prep(b2.reshape(1, E), 1, E_pad, jnp.float32)

    # Advisory cost for XLA: W1/W2 (+ b1) are re-streamed once per row tile.
    cost = pl.CostEstimate(
        flops=4 * M_pad * E_pad * F_pad,          # two matmuls: 2*M*E*F each
        transcendentals=0,
        bytes_accessed=(M_pad * E_pad * (x_item + out_item)
                        + grid[0] * (2 * E_pad * F_pad * w_item + F_pad * 4)
                        + E_pad * 4),
    )

    in_specs = [
        pl.BlockSpec((tm_eff, E_pad), lambda i, f: (i, 0)),   # x rows (resident over f)
        pl.BlockSpec((E_pad, tf_eff), lambda i, f: (0, f)),   # W1 tile
        pl.BlockSpec((1, tf_eff), lambda i, f: (0, f)),       # b1 tile
        pl.BlockSpec((tf_eff, E_pad), lambda i, f: (f, 0)),   # W2 tile
        pl.BlockSpec((1, E_pad), lambda i, f: (0, 0)),        # b2 (resident)
    ]
    out_spec = pl.BlockSpec((tm_eff, E_pad), lambda i, f: (i, 0))

    kernel = _ffn_kernel_acc if needs_acc else _ffn_kernel_f32out
    scratch = ([pltpu.VMEM((tm_eff, E_pad), jnp.float32)] if needs_acc else [])

    out2 = pl.pallas_call(
        kernel,
        out_shape=jax.ShapeDtypeStruct((M_pad, E_pad), out_dtype),
        grid_spec=pltpu.PrefetchScalarGridSpec(
            num_scalar_prefetch=0,
            grid=grid,
            in_specs=in_specs,
            out_specs=out_spec,
            scratch_shapes=scratch,
        ),
        compiler_params=pltpu.CompilerParams(
            dimension_semantics=("parallel", "arbitrary"),
            vmem_limit_bytes=vmem_limit,
        ),
        cost_estimate=cost,
    )(x2, w1p, b1p, w2p, b2p)

    if (M_pad, E_pad) != (M, E):
        out2 = out2[:M, :E]
    return out2.reshape(B, S, E)


def _init_params(key, embed_dim, ffn_dim, dtype=jnp.float32):
    """Deterministic init mimicking nn.Linear's uniform(-1/sqrt(fan_in), ...)."""
    k1, k2, k3, k4 = jax.random.split(key, 4)
    lim1 = 1.0 / (embed_dim ** 0.5)
    lim2 = 1.0 / (ffn_dim ** 0.5)
    # stored transposed vs. PyTorch: (in, out)
    w1 = jax.random.uniform(k1, (embed_dim, ffn_dim), dtype, -lim1, lim1)
    b1 = jax.random.uniform(k2, (ffn_dim,), dtype, -lim1, lim1)
    w2 = jax.random.uniform(k3, (ffn_dim, embed_dim), dtype, -lim2, lim2)
    b2 = jax.random.uniform(k4, (embed_dim,), dtype, -lim2, lim2)
    return w1, b1, w2, b2


if __name__ == "__main__":
    B, S, E, Fdim = 2, 8, 32, 64  # batch, seq, embed_dim, ffn_dim

    key = jax.random.PRNGKey(0)
    kx, kp = jax.random.split(key)
    x = jax.random.normal(kx, (B, S, E), jnp.float32)
    w1, b1, w2, b2 = _init_params(kp, E, Fdim)

    # Reference in plain JAX (same math as the PyTorch module in eval mode).
    ref = jnp.maximum(x.reshape(-1, E) @ w1 + b1, 0.0) @ w2 + b2
    ref = ref.reshape(B, S, E)

    # 1) f32 path (tight tolerance; exercises accumulate-into-output kernel).
    out = jax.block_until_ready(feed_forward(x, w1, b1, w2, b2))
    assert out.shape == (B, S, E)
    assert jnp.allclose(out, ref, atol=2e-5, rtol=1e-5)

    # 2) bf16 weight/activation streaming, f32 output (main perf configuration).
    out_bf16s = jax.block_until_ready(
        feed_forward(x, w1, b1, w2, b2, compute_dtype=jnp.bfloat16))
    assert out_bf16s.dtype == jnp.float32
    assert jnp.allclose(out_bf16s, ref, atol=8e-2, rtol=8e-2)

    # 3) bf16 in / bf16 out (exercises the f32 VMEM-scratch accumulator kernel).
    out_bf16 = jax.block_until_ready(
        feed_forward(x.astype(jnp.bfloat16), w1.astype(jnp.bfloat16), b1,
                     w2.astype(jnp.bfloat16), b2))
    assert out_bf16.dtype == jnp.bfloat16
    assert jnp.allclose(out_bf16.astype(jnp.float32), ref, atol=1e-1, rtol=1e-1)

    print("KERNEL_OK")
</pallas_src>

<mosaic_0001>
module attributes {stable_mosaic.version = 11 : i64} {
  func.func @_ffn_kernel_f32out(%arg0: i32, %arg1: i32, %arg2: memref<16x128xf32, #tpu.memory_space<vmem>>, %arg3: memref<128x128xf32, #tpu.memory_space<vmem>>, %arg4: memref<1x128xf32, #tpu.memory_space<vmem>>, %arg5: memref<128x128xf32, #tpu.memory_space<vmem>>, %arg6: memref<1x128xf32, #tpu.memory_space<vmem>>, %arg7: memref<16x128xf32, #tpu.memory_space<vmem>>) attributes {dimension_semantics = [#tpu.dimension_semantics<parallel>, #tpu.dimension_semantics<arbitrary>], iteration_bounds = array<i64: 1, 1>, scalar_prefetch = 0 : i64, scratch_operands = 0 : i64, tpu.core_type = #tpu.core_type<tc>, window_params = [{transform_indices = @transform_0, window_bounds = array<i64: 16, 128>}, {transform_indices = @transform_1, window_bounds = array<i64: 128, 128>}, {transform_indices = @transform_2, window_bounds = array<i64: 1, 128>}, {transform_indices = @transform_3, window_bounds = array<i64: 128, 128>}, {pipeline_mode = #tpu.pipeline_mode<synchronous>, transform_indices = @transform_4, window_bounds = array<i64: 1, 128>}, {transform_indices = @transform_5, window_bounds = array<i64: 16, 128>}]} {
    %c0 = arith.constant 0 : index
    %c0_0 = arith.constant 0 : index
    %0 = vector.load %arg2[%c0, %c0_0] : memref<16x128xf32, #tpu.memory_space<vmem>>, vector<16x128xf32>
    %c0_1 = arith.constant 0 : index
    %c0_2 = arith.constant 0 : index
    %1 = vector.load %arg3[%c0_1, %c0_2] : memref<128x128xf32, #tpu.memory_space<vmem>>, vector<128x128xf32>
    %cst = arith.constant dense<0.000000e+00> : vector<16x128xf32>
    %2 = tpu.matmul %0, %1, %cst {dimension_numbers = #tpu.dot_dimension_numbers<[1], [0], [0], [1], [0, 0, 1, 1], [], []>} : vector<16x128xf32>, vector<128x128xf32>, vector<16x128xf32> -> vector<16x128xf32>
    %c0_3 = arith.constant 0 : index
    %c0_4 = arith.constant 0 : index
    %3 = vector.load %arg4[%c0_3, %c0_4] : memref<1x128xf32, #tpu.memory_space<vmem>>, vector<1x128xf32>
    %4 = vector.broadcast %3 : vector<1x128xf32> to vector<16x128xf32>
    %5 = arith.addf %2, %4 : vector<16x128xf32>
    %cst_5 = arith.constant 0.000000e+00 : f32
    %6 = vector.broadcast %cst_5 : f32 to vector<16x128xf32>
    %7 = arith.maximumf %5, %6 : vector<16x128xf32>
    %c0_6 = arith.constant 0 : index
    %c0_7 = arith.constant 0 : index
    %8 = vector.load %arg5[%c0_6, %c0_7] : memref<128x128xf32, #tpu.memory_space<vmem>>, vector<128x128xf32>
    %cst_8 = arith.constant dense<0.000000e+00> : vector<16x128xf32>
    %9 = tpu.matmul %7, %8, %cst_8 {dimension_numbers = #tpu.dot_dimension_numbers<[1], [0], [0], [1], [0, 0, 1, 1], [], []>} : vector<16x128xf32>, vector<128x128xf32>, vector<16x128xf32> -> vector<16x128xf32>
    %c0_i32 = arith.constant 0 : i32
    %10 = arith.cmpi eq, %arg1, %c0_i32 : i32
    %11 = arith.extui %10 : i1 to i32
    %c0_i32_9 = arith.constant 0 : i32
    %12 = arith.cmpi ne, %11, %c0_i32_9 : i32
    scf.if %12 {
      %c0_12 = arith.constant 0 : index
      %c0_13 = arith.constant 0 : index
      %16 = vector.load %arg6[%c0_12, %c0_13] : memref<1x128xf32, #tpu.memory_space<vmem>>, vector<1x128xf32>
      %17 = vector.broadcast %16 : vector<1x128xf32> to vector<16x128xf32>
      %18 = arith.addf %9, %17 : vector<16x128xf32>
      %c0_14 = arith.constant 0 : index
      %c0_15 = arith.constant 0 : index
      %19 = vector.load %arg7[%c0_14, %c0_15] : memref<16x128xf32, #tpu.memory_space<vmem>>, vector<16x128xf32>
      tpu.vector_store %arg7[%c0_14, %c0_15], %18 {strides = array<i32>} : memref<16x128xf32, #tpu.memory_space<vmem>>, vector<16x128xf32>,
    } else {
    }
    %c0_i32_10 = arith.constant 0 : i32
    %13 = arith.cmpi ne, %arg1, %c0_i32_10 : i32
    %14 = arith.extui %13 : i1 to i32
    %c0_i32_11 = arith.constant 0 : i32
    %15 = arith.cmpi ne, %14, %c0_i32_11 : i32
    scf.if %15 {
      %c0_12 = arith.constant 0 : index
      %c0_13 = arith.constant 0 : index
      %16 = vector.load %arg7[%c0_12, %c0_13] : memref<16x128xf32, #tpu.memory_space<vmem>>, vector<16x128xf32>
      %17 = arith.addf %16, %9 : vector<16x128xf32>
      %c0_14 = arith.constant 0 : index
      %c0_15 = arith.constant 0 : index
      %18 = vector.load %arg7[%c0_14, %c0_15] : memref<16x128xf32, #tpu.memory_space<vmem>>, vector<16x128xf32>
      tpu.vector_store %arg7[%c0_14, %c0_15], %17 {strides = array<i32>} : memref<16x128xf32, #tpu.memory_space<vmem>>, vector<16x128xf32>,
    } else {
    }
    return
  }
  func.func @transform_0(%arg0: i32, %arg1: i32) -> (i32, i32) {
    %c0_i32 = arith.constant 0 : i32
    %c0_i32_0 = arith.constant 0 : i32
    return %arg0, %c0_i32 : i32, i32
  }
  func.func @transform_1(%arg0: i32, %arg1: i32) -> (i32, i32) {
    %c0_i32 = arith.constant 0 : i32
    %c0_i32_0 = arith.constant 0 : i32
    return %c0_i32, %arg1 : i32, i32
  }
  func.func @transform_2(%arg0: i32, %arg1: i32) -> (i32, i32) {
    %c0_i32 = arith.constant 0 : i32
    %c0_i32_0 = arith.constant 0 : i32
    return %c0_i32, %arg1 : i32, i32
  }
  func.func @transform_3(%arg0: i32, %arg1: i32) -> (i32, i32) {
    %c0_i32 = arith.constant 0 : i32
    %c0_i32_0 = arith.constant 0 : i32
    return %arg1, %c0_i32 : i32, i32
  }
  func.func @transform_4(%arg0: i32, %arg1: i32) -> (i32, i32) {
    %c0_i32 = arith.constant 0 : i32
    %c0_i32_0 = arith.constant 0 : i32
    %c0_i32_1 = arith.constant 0 : i32
    return %c0_i32, %c0_i32_0 : i32, i32
  }
  func.func @transform_5(%arg0: i32, %arg1: i32) -> (i32, i32) {
    %c0_i32 = arith.constant 0 : i32
    %c0_i32_0 = arith.constant 0 : i32
    return %arg0, %c0_i32 : i32, i32
  }
}

</mosaic_0001>

<bundles_post_ra>
// kernel: feed_forward.1
= control target key start
LH: loop header
LB: loop body
LE: loop exit
PB: predicated region body
PF: predicated region fallthrough
CT: control target
= control target key end

     0   :  { %s558_s1 = inlined_call_operand.vmem [shape: f32[128,128], index: 1, kind: input, shape index: {}]   ;;  %s559_s0 = inlined_call_operand.vmem [shape: f32[16,128], index: 0, kind: input, shape index: {}]   ;;  %s560_s3 = inlined_call_operand.vmem [shape: f32[128,128], index: 3, kind: input, shape index: {}]   ;;  %s561_s2 = inlined_call_operand.vmem [shape: f32[1,128], index: 2, kind: input, shape index: {}]   ;;  %s562_s4 = inlined_call_operand.vmem [shape: f32[1,128], index: 4, kind: input, shape index: {}]   ;;  %s563_s5 = inlined_call_operand.vmem [shape: f32[16,128], index: 5, kind: output, shape index: {}]  }
   0x1   :  { %v22_v0 = vld [vmem:[%s558_s1] sm:$0xff]  ;;  %v23_v1 = vld [vmem:[%s558_s1 + $0x8] sm:$0xff]  ;;  %v24_v2 = vld [vmem:[%s558_s1 + $0x10] sm:$0xff] }
   0x2   :  { %v350_v3 = vpack.c.bf16 %v23_v1, %v22_v0  ;;  %v25_v4 = vld [vmem:[%s558_s1 + $0x18] sm:$0xff]  ;;  %v26_v6 = vld [vmem:[%s558_s1 + $0x20] sm:$0xff]  ;;  %v27_v7 = vld [vmem:[%s558_s1 + $0x28] sm:$0xff] }
   0x3   :  { %v354_v5 = vpack.c.bf16 %v25_v4, %v24_v2  ;;  %v358_v8 = vpack.c.bf16 %v27_v7, %v26_v6  ;;  %v28_v9 = vld [vmem:[%s558_s1 + $0x30] sm:$0xff]  ;;  %v29_v10 = vld [vmem:[%s558_s1 + $0x38] sm:$0xff]  ;;  %v20_v11 = vld [vmem:[%s559_s0] sm:$0xff] }
   0x4   :  { %351 = vmatprep.subr.bf16.mxu0 %v350_v3  ;;  %312 = vmatprep.mubr.f32.mxu0 %v20_v11  ;;  %v122_v12 = vld [vmem:[%s560_s3] sm:$0xff]  ;;  %v123_v13 = vld [vmem:[%s560_s3 + $0x8] sm:$0xff]  ;;  %v124_v14 = vld [vmem:[%s560_s3 + $0x10] sm:$0xff]  ;;  %v362_v20 = vpack.c.bf16 %v29_v10, %v28_v9 }
   0x5   :  { %353 = vmatpush3.bf16.msra.mxu0 %v350_v3  ;;  %v382_v15 = vpack.c.bf16 %v123_v13, %v122_v12  ;;  %v125_v16 = vld [vmem:[%s560_s3 + $0x18] sm:$0xff]  ;;  %v126_v18 = vld [vmem:[%s560_s3 + $0x20] sm:$0xff]  ;;  %v127_v19 = vld [vmem:[%s560_s3 + $0x28] sm:$0xff] }
   0x6   :  { %355 = vmatprep.subr.bf16.mxu0 %v354_v5  ;;  %v386_v17 = vpack.c.bf16 %v125_v16, %v124_v14  ;;  %v30_v21 = vld [vmem:[%s558_s1 + $0x40] sm:$0xff]  ;;  %v31_v22 = vld [vmem:[%s558_s1 + $0x48] sm:$0xff]  ;;  %v390_v23 = vpack.c.bf16 %v127_v19, %v126_v18  ;;  %v128_v24 = vld [vmem:[%s560_s3 + $0x30] sm:$0xff] }
   0x7   :  { %383 = vmatprep.subr.bf16.mxu1 %v382_v15  ;;  %v129_v25 = vld [vmem:[%s560_s3 + $0x38] sm:$0xff]  ;;  %v366_v26 = vpack.c.bf16 %v31_v22, %v30_v21  ;;  %v32_v27 = vld [vmem:[%s558_s1 + $0x50] sm:$0xff]  ;;  %v130_v30 = vld [vmem:[%s560_s3 + $0x40] sm:$0xff] }
   0x8   :  { %385 = vmatpush3.bf16.msra.mxu1 %v382_v15  ;;  %v33_v28 = vld [vmem:[%s558_s1 + $0x58] sm:$0xff]  ;;  %v394_v29 = vpack.c.bf16 %v129_v25, %v128_v24  ;;  %v131_v31 = vld [vmem:[%s560_s3 + $0x48] sm:$0xff]  ;;  %v34_v33 = vld [vmem:[%s558_s1 + $0x60] sm:$0xff] }
   0x9   :  { %357 = vmatpush3.bf16.msra.mxu0 %v354_v5  ;;  %387 = vmatprep.subr.bf16.mxu1 %v386_v17  ;;  %v370_v32 = vpack.c.bf16 %v33_v28, %v32_v27  ;;  %v35_v34 = vld [vmem:[%s558_s1 + $0x68] sm:$0xff]  ;;  %v398_v35 = vpack.c.bf16 %v131_v31, %v130_v30  ;;  %v132_v36 = vld [vmem:[%s560_s3 + $0x50] sm:$0xff]  ;;  %v133_v37 = vld [vmem:[%s560_s3 + $0x58] sm:$0xff] }
   0xa   :  { %359 = vmatprep.subr.bf16.mxu0 %v358_v8  ;;  %v374_v38 = vpack.c.bf16 %v35_v34, %v34_v33  ;;  %v36_v39 = vld [vmem:[%s558_s1 + $0x70] sm:$0xff]  ;;  %v37_v40 = vld [vmem:[%s558_s1 + $0x78] sm:$0xff]  ;;  %v402_v41 = vpack.c.bf16 %v133_v37, %v132_v36  ;;  %v134_v42 = vld [vmem:[%s560_s3 + $0x60] sm:$0xff] }
   0xb   :  { %v135_v43 = vld [vmem:[%s560_s3 + $0x68] sm:$0xff]  ;;  %v378_v44 = vpack.c.bf16 %v37_v40, %v36_v39  ;;  %v136_v47 = vld [vmem:[%s560_s3 + $0x70] sm:$0xff]  ;;  %v137_v48 = vld [vmem:[%s560_s3 + $0x78] sm:$0xff] }
   0xc   :  { %389 = vmatpush3.bf16.msra.mxu1 %v386_v17  ;;  %v406_v45 = vpack.c.bf16 %v135_v43, %v134_v42  ;;  %v21_v46 = vld [vmem:[%s559_s0 + $0x8] sm:$0xff]  ;;  %v410_v49 = vpack.c.bf16 %v137_v48, %v136_v47  ;;  %v242_v50 = vld [vmem:[%s561_s2] ss:$0 sm:$0xff] }
   0xd   :  { %361 = vmatpush3.bf16.msra.mxu0 %v358_v8  ;;  %391 = vmatprep.subr.bf16.mxu1 %v390_v23  ;;  %v243_v57 = vld [vmem:[%s562_s4] ss:$0 sm:$0xff] }
   0xe   :  { %363 = vmatprep.subr.bf16.mxu0 %v362_v20 }
  0x10   :  { %393 = vmatpush3.bf16.msra.mxu1 %v390_v23 }
  0x11   :  { %365 = vmatpush3.bf16.msra.mxu0 %v362_v20  ;;  %395 = vmatprep.subr.bf16.mxu1 %v394_v29 }
  0x12   :  { %367 = vmatprep.subr.bf16.mxu0 %v366_v26 }
  0x14   :  { %397 = vmatpush3.bf16.msra.mxu1 %v394_v29 }
  0x15   :  { %369 = vmatpush3.bf16.msra.mxu0 %v366_v26  ;;  %399 = vmatprep.subr.bf16.mxu1 %v398_v35 }
  0x16   :  { %371 = vmatprep.subr.bf16.mxu0 %v370_v32 }
  0x18   :  { %401 = vmatpush3.bf16.msra.mxu1 %v398_v35 }
  0x19   :  { %373 = vmatpush3.bf16.msra.mxu0 %v370_v32  ;;  %403 = vmatprep.subr.bf16.mxu1 %v402_v41 }
  0x1a   :  { %375 = vmatprep.subr.bf16.mxu0 %v374_v38 }
  0x1c   :  { %405 = vmatpush3.bf16.msra.mxu1 %v402_v41 }
  0x1d   :  { %377 = vmatpush3.bf16.msra.mxu0 %v374_v38  ;;  %407 = vmatprep.subr.bf16.mxu1 %v406_v45 }
  0x1e   :  { %379 = vmatprep.subr.bf16.mxu0 %v378_v44 }
  0x20   :  { %409 = vmatpush3.bf16.msra.mxu1 %v406_v45 }
  0x21   :  { %381 = vmatpush3.bf16.msra.mxu0 %v378_v44  ;;  %411 = vmatprep.subr.bf16.mxu1 %v410_v49 }
  0x24   :  { %313 = vmatmul.mubr.f32.vlgmr.msra.gmra.mrb[0].mxu0 %v21_v46  ;;  %413 = vmatpush3.bf16.msra.mxu1 %v410_v49 }
  0xf7   :  { %v314_v51 = vpop.f32.mrb[0].mxu0 }
  0xf8   :  { %v117_v52 = vadd.f32 %v314_v51, %v242_v50  ;;  %v111_v53 = vpop.f32.mrb[1].mxu0 }
  0xf9   :  { %v112_v54 = vadd.f32 %v242_v50, %v111_v53 }
  0xfa   :  { %v121_v56 = vmax.f32 %v117_v52, 0.0 }
  0xfb   :  { %v120_v55 = vmax.f32 %v112_v54, 0.0 }
  0xfd   :  { %347 = vmatprep.mubr.f32.mxu1 %v120_v55 }
  0xfe   :  { %348 = vmatmul.mubr.f32.vlgmr.msra.gmra.mrb[0].mxu1 %v121_v56 }
 0x1d1   :  { %v349_v58 = vpop.f32.mrb[0].mxu1 }
 0x1d2   :  { %v225_v59 = vadd.f32 %v349_v58, %v243_v57  ;;  %v204_v60 = vpop.f32.mrb[1].mxu1 }
 0x1d3   :  { %v224_v61 = vadd.f32 %v243_v57, %v204_v60 }
 0x1d4   :  { %227 = vst [vmem:[%s563_s5 + $0x8] sm:$0xff] %v225_v59 }
 0x1d5   :  { %226 = vst [vmem:[%s563_s5] sm:$0xff] %v224_v61 }

</bundles_post_ra>
